<compile_context>
chip_gen: v7x
topology: tpu7x:2x2x1
jax: 0.10.0
libtpu: 0.0.40
codegen_flags: <defaults>
</compile_context>

<pallas_src>
import functools

import jax
import jax.numpy as jnp
import numpy as np
from jax.experimental import pallas as pl
from jax.experimental.pallas import tpu as pltpu

_LANES = 128
_SUBLANES = 8


def _round_up(x, m):
    return ((x + m - 1) // m) * m


# --------------------------- parameter construction ---------------------------

def init_params(key, hidden_size, deepness, latent_dim, N_filter_bank, param_per_env):
    """Deterministic synthetic params in the module's natural (unfused) order.

    Each Linear is stored pre-transposed as (in, out); gamma/beta are (1, out).
    Order: encoder_1 (deepness x [W,b,g,beta]), encoder_2 [W,b],
           a_decoder_1, a_decoder_2, p_decoder_1, p_decoder_2.
    """
    params = []

    def linear_params(key, d_in, d_out):
        k1, k2 = jax.random.split(key)
        w = jax.random.normal(k1, (d_in, d_out), jnp.float32) * (1.0 / np.sqrt(d_in))
        b = jax.random.normal(k2, (1, d_out), jnp.float32) * 0.01
        return [w, b]

    def mlp_params(key, d_in, d_hidden, n_layers):
        out = []
        dims = [d_in] + [d_hidden] * n_layers
        for i in range(n_layers):
            key, sub = jax.random.split(key)
            out += linear_params(sub, dims[i], dims[i + 1])
            key, kg, kb = jax.random.split(key, 3)
            out += [1.0 + 0.1 * jax.random.normal(kg, (1, dims[i + 1]), jnp.float32),
                    0.1 * jax.random.normal(kb, (1, dims[i + 1]), jnp.float32)]
        return out, key

    out_dim = N_filter_bank * param_per_env

    blk, key = mlp_params(key, N_filter_bank, hidden_size, deepness)   # encoder_1
    params += blk
    key, sub = jax.random.split(key)
    params += linear_params(sub, hidden_size, latent_dim)              # encoder_2

    blk, key = mlp_params(key, latent_dim, hidden_size, deepness)      # a_decoder_1
    params += blk
    key, sub = jax.random.split(key)
    params += linear_params(sub, hidden_size, out_dim)                 # a_decoder_2

    blk, key = mlp_params(key, latent_dim, hidden_size, deepness)      # p_decoder_1
    params += blk
    key, sub = jax.random.split(key)
    params += linear_params(sub, hidden_size, out_dim)                 # p_decoder_2

    return params


def pack_params(params, deepness, hidden_size, latent_dim, out_dim):
    """Fuse a/p decoder branches and pack everything into one (rows, 128) slab.

    Every weight matrix is stored as a full zero-padded (128, 128) block so
    the kernel can carry activations at 128 lanes and do full-width matmuls
    with no partial-lane reads.  Every bias/gamma/beta occupies an 8-row block
    (row 0 meaningful, zero elsewhere -> padded lanes stay zero after the
    LayerNorm affine).

    Returns (slab, reads). `reads` is a static tuple of (row_offset, n_rows)
    in the exact order the kernel consumes parameters (n_rows is 128 for
    weights, 1 for vectors).
    """
    # Fused-layout preconditions (fail loudly, not with masked stores).
    assert 2 * hidden_size <= _LANES, "fused decoder width 2*hidden_size must fit 128 lanes"
    assert latent_dim <= _LANES, "latent_dim must fit 128 lanes"
    assert 2 * out_dim == _LANES, \
        "roll-swap epilogue + unmasked output store require 2*out_dim == 128"

    p = [np.asarray(a, np.float32) for a in params]
    it = iter(p)

    def grab(n):
        return [next(it) for _ in range(n)]

    enc1 = grab(4 * deepness)
    enc2 = grab(2)
    a1 = grab(4 * deepness)
    a2 = grab(2)
    p1 = grab(4 * deepness)
    p2 = grab(2)
    assert next(it, None) is None, "unexpected extra parameters"

    def block_diag(wa, wp):
        return np.block([
            [wa, np.zeros((wa.shape[0], wp.shape[1]), np.float32)],
            [np.zeros((wp.shape[0], wa.shape[1]), np.float32), wp],
        ])

    mats = []                                      # list of (kind, array)
    for i in range(deepness):                      # encoder MLP (unchanged)
        w, b, g, bt = enc1[4 * i:4 * i + 4]
        mats += [("w", w), ("v", b), ("v", g), ("v", bt)]
    mats += [("w", enc2[0]), ("v", enc2[1])]       # encoder head (latent)

    for i in range(deepness):                      # fused [a | p] decoder MLP
        wa, ba, ga, bta = a1[4 * i:4 * i + 4]
        wp, bp, gp, btp = p1[4 * i:4 * i + 4]
        w = np.concatenate([wa, wp], axis=1) if i == 0 else block_diag(wa, wp)
        mats += [("w", w),
                 ("v", np.concatenate([ba, bp], axis=1)),
                 ("v", np.concatenate([ga, gp], axis=1)),
                 ("v", np.concatenate([bta, btp], axis=1))]

    wa, ba = a2
    wp, bp = p2
    mats += [("w", block_diag(wa, wp)),            # fused output heads (2H, 2*out_dim)
             ("v", np.concatenate([ba, bp], axis=1))]

    reads = []
    blocks = []
    row = 0
    for kind, m in mats:
        r, c = m.shape
        assert c <= _LANES, "feature width exceeds one lane tile"
        if kind == "w":
            assert r <= _LANES, "contraction width exceeds one lane tile"
            n_block = _LANES                       # K padded to 128 -> full-width matmul
            reads.append((row, _LANES))
        else:
            n_block = _SUBLANES
            reads.append((row, 1))
        blk = np.zeros((n_block, _LANES), np.float32)
        blk[:r, :c] = m
        blocks.append(blk)
        row += n_block

    slab = np.concatenate(blocks, axis=0)
    return jnp.asarray(slab), tuple(reads)


# --------------------------------- kernel -------------------------------------

def _make_kernel(reads, deepness, hidden_size, latent_dim, out_dim, block_b):
    two_pi = np.float32(2.0 * np.pi)
    half_pi = np.float32(0.5 * np.pi)

    def kernel(x_ref, slab_ref, out_ref):
        cursor = [0]

        def take():
            off, n_rows = reads[cursor[0]]
            cursor[0] += 1
            return slab_ref[off:off + n_rows, :]   # static, sublane-aligned, full 128 lanes

        # Hoisted lane masks: built ONCE per grid step (JAX does not CSE
        # broadcast_in_dim, so per-layer rebuilds would cost deepness+1 iotas).
        lane = jax.lax.broadcasted_iota(jnp.int32, (block_b, _LANES), 1)
        in_a = lane < hidden_size                  # a-branch lanes in fused decoder
        is_real = lane < out_dim                   # real half of fused output
        phase_off = jnp.where(is_real, half_pi, jnp.float32(0.0))   # cos(x) == sin(x+pi/2)

        def linear(h):
            w = take()
            b = take()
            return jnp.dot(h, w, preferred_element_type=jnp.float32) + b

        def leaky(h):
            return jnp.maximum(h, 0.01 * h)

        def ln_leaky(h, gamma, beta, width):
            # LayerNorm over the true feature width. Padded lanes of h are zero
            # so full-lane sums equal width-lane sums; gamma=beta=0 in padded
            # lanes keeps them zero after the affine.
            # E[h^2]-mu^2 form: the two cross-lane reduces are independent.
            inv = jnp.float32(1.0 / width)
            s1 = jnp.sum(h, axis=-1, keepdims=True)
            s2 = jnp.sum(h * h, axis=-1, keepdims=True)
            mu = s1 * inv
            var = jnp.maximum(s2 * inv - mu * mu, 0.0)
            h = (h - mu) * jax.lax.rsqrt(var + 1e-5) * gamma + beta
            return leaky(h)

        def fused_ln_leaky(h, gamma, beta, half):
            # h = [a-branch | p-branch | zero padding]; LayerNorm each half of
            # width `half` independently via masked reduces (all 4 independent).
            # Padded lanes contribute zeros and are re-zeroed by gamma=beta=0.
            z = jnp.zeros_like(h)
            h2 = h * h
            s1a = jnp.sum(jnp.where(in_a, h, z), axis=-1, keepdims=True)
            s1p = jnp.sum(jnp.where(in_a, z, h), axis=-1, keepdims=True)
            s2a = jnp.sum(jnp.where(in_a, h2, z), axis=-1, keepdims=True)
            s2p = jnp.sum(jnp.where(in_a, z, h2), axis=-1, keepdims=True)
            inv = jnp.float32(1.0 / half)
            mu = jnp.where(in_a, s1a, s1p) * inv
            ex2 = jnp.where(in_a, s2a, s2p) * inv
            var = jnp.maximum(ex2 - mu * mu, 0.0)
            h = (h - mu) * jax.lax.rsqrt(var + 1e-5) * gamma + beta
            return leaky(h)

        # ---------------- encode ----------------
        # x block is (block_b, 128); lanes >= N_filter_bank are zero (host pad).
        # Zero-padded batch rows flow through LN with var=0 -> rsqrt(1e-5):
        # finite, and those rows are discarded in the wrapper (benign).
        h = x_ref[...].astype(jnp.float32)
        for _ in range(deepness):
            h = linear(h)
            gamma = take()
            beta = take()
            h = ln_leaky(h, gamma, beta, hidden_size)
        l = jax.nn.sigmoid(linear(h))              # lanes [0, latent) meaningful

        # ------------- decode (a | p fused) -------------
        h = l
        for _ in range(deepness):
            h = linear(h)                          # one wide matmul for both branches
            gamma = take()
            beta = take()
            h = fused_ln_leaky(h, gamma, beta, hidden_size)
        g = jax.nn.sigmoid(linear(h))              # (block_b, 128) = [a | p_sig]

        # Output layout: lanes [0,out_dim) -> real = a*cos(2*pi*p_sig),
        #                lanes [out_dim,128) -> imag = a*sin(2*pi*p_sig).
        # One XLU roll (shift == half width, sign-symmetric) lines up a with
        # p, and a single sine with a per-lane +pi/2 offset replaces sin+cos.
        rolled = pltpu.roll(g, out_dim, 1)         # swap the two 64-lane halves
        a_b = jnp.where(is_real, g, rolled)        # amplitude in all lanes
        p_b = two_pi * jnp.where(is_real, rolled, g)
        out_ref[...] = a_b * jnp.sin(p_b + phase_off)   # unmasked 128-lane store

    return kernel


# -------------------------------- wrapper --------------------------------------

def _pick_block_b(B):
    """Choose (block_b, padded_B).

    Big tiles (up to 1024) cut the ~0.35us/step grid overhead that dominates
    this tiny-FLOP kernel; but keep >= 2 grid steps whenever the batch allows
    so the ("parallel",) batch axis can shard across both v7x TensorCores
    (one extra tiny step is harmless on single-TC v5e/v6e).
    """
    b8 = _round_up(max(B, 1), _SUBLANES)
    if b8 <= _SUBLANES:
        return b8, b8                              # single 8-row tile
    max_tile = 1024
    block_b = min(max_tile, _round_up((b8 + 1) // 2, _SUBLANES))
    bp = _round_up(b8, block_b)
    return block_b, bp


@functools.partial(jax.jit, static_argnames=("reads", "deepness", "hidden_size",
                                              "latent_dim", "out_dim", "block_b"))
def _forward_packed(x, slab, *, reads, deepness, hidden_size, latent_dim, out_dim, block_b):
    Bp, F = x.shape                                # F == 128 (lane-dense input)
    kernel = _make_kernel(reads, deepness, hidden_size, latent_dim, out_dim, block_b)

    n_matmuls = 2 * (deepness + 1)
    cost = pl.CostEstimate(
        flops=int(2 * Bp * _LANES * _LANES * n_matmuls),
        transcendentals=int(Bp * _LANES * 3),      # 2 sigmoids + 1 sine per lane
        bytes_accessed=int(4 * (x.size + slab.size + Bp * 2 * out_dim)),
    )

    return pl.pallas_call(
        kernel,
        out_shape=jax.ShapeDtypeStruct((Bp, 2 * out_dim), jnp.float32),
        grid_spec=pltpu.PrefetchScalarGridSpec(
            num_scalar_prefetch=0,
            grid=(Bp // block_b,),
            in_specs=[
                pl.BlockSpec((block_b, F), lambda i: (i, 0)),       # activations: tiled over batch
                pl.BlockSpec(slab.shape, lambda i: (0, 0)),         # weight slab: resident
            ],
            out_specs=pl.BlockSpec((block_b, 2 * out_dim), lambda i: (i, 0)),
        ),
        compiler_params=pltpu.CompilerParams(
            dimension_semantics=("parallel",),     # v7x: batch tiles shard across both TCs
        ),
        cost_estimate=cost,
    )(x, slab)


def vae_subenv_forward(x, slab, reads, *, deepness, hidden_size, latent_dim, out_dim):
    """Returns (real_param, imag_param), each (B, out_dim)."""
    B, F = x.shape
    assert F <= _LANES, "input feature width must fit one lane tile"
    block_b, Bp = _pick_block_b(B)
    # Pad batch (padded rows are benign: LN sees var=0 -> finite output, rows
    # are sliced off below) and pad features to a full 128-lane tile so the
    # input DMA / in-kernel load is lane-dense.
    x = jnp.pad(x, ((0, Bp - B), (0, _LANES - F)))
    out = _forward_packed(x, slab, reads=reads, deepness=deepness,
                          hidden_size=hidden_size, latent_dim=latent_dim,
                          out_dim=out_dim, block_b=block_b)
    return out[:B, :out_dim], out[:B, out_dim:]


# ------------------------------- reference -------------------------------------

def _reference(x, params, deepness):
    """Pure-JAX reference using the original (unfused, unpacked) parameters."""
    idx = [0]

    def take():
        v = params[idx[0]]
        idx[0] += 1
        return v

    def linear(h):
        w, b = take(), take()
        return h @ w + b

    def mlp_block(h):
        for _ in range(deepness):
            h = linear(h)
            g, bt = take(), take()
            mu = jnp.mean(h, -1, keepdims=True)
            var = jnp.mean((h - mu) ** 2, -1, keepdims=True)
            h = (h - mu) / jnp.sqrt(var + 1e-5) * g + bt
            h = jnp.where(h > 0, h, 0.01 * h)
        return h

    l = jax.nn.sigmoid(linear(mlp_block(x)))
    a = jax.nn.sigmoid(linear(mlp_block(l)))
    p = 2.0 * jnp.pi * jax.nn.sigmoid(linear(mlp_block(l)))
    return a * jnp.cos(p), a * jnp.sin(p)


if __name__ == "__main__":
    # Small shapes consistent with the module.
    hidden_size = 32
    deepness = 2
    latent_dim = 8
    N_filter_bank = 16
    param_per_env = 4
    batch = 8
    out_dim = N_filter_bank * param_per_env       # 64 -> fused output width 128 lanes

    key = jax.random.PRNGKey(0)
    k_x, k_p = jax.random.split(key)
    x = jax.random.normal(k_x, (batch, N_filter_bank), jnp.float32)
    params = init_params(k_p, hidden_size, deepness, latent_dim,
                         N_filter_bank, param_per_env)
    slab, reads = pack_params(params, deepness, hidden_size, latent_dim, out_dim)

    real, imag = vae_subenv_forward(x, slab, reads, deepness=deepness,
                                    hidden_size=hidden_size, latent_dim=latent_dim,
                                    out_dim=out_dim)
    jax.block_until_ready((real, imag))

    ref_real, ref_imag = _reference(x, params, deepness)
    np.testing.assert_allclose(np.asarray(real), np.asarray(ref_real), atol=1e-4, rtol=1e-4)
    np.testing.assert_allclose(np.asarray(imag), np.asarray(ref_imag), atol=1e-4, rtol=1e-4)

    print("KERNEL_OK")
</pallas_src>

<mosaic_0001>
module attributes {stable_mosaic.version = 11 : i64} {
  func.func @kernel(%arg0: i32, %arg1: memref<8x128xf32, #tpu.memory_space<vmem>>, %arg2: memref<880x128xf32, #tpu.memory_space<vmem>>, %arg3: memref<8x128xf32, #tpu.memory_space<vmem>>) attributes {dimension_semantics = [#tpu.dimension_semantics<parallel>], iteration_bounds = array<i64: 1>, scalar_prefetch = 0 : i64, scratch_operands = 0 : i64, tpu.core_type = #tpu.core_type<tc>, window_params = [{transform_indices = @transform_0, window_bounds = array<i64: 8, 128>}, {pipeline_mode = #tpu.pipeline_mode<synchronous>, transform_indices = @transform_1, window_bounds = array<i64: 880, 128>}, {transform_indices = @transform_2, window_bounds = array<i64: 8, 128>}]} {
    %0 = tpu.iota {dimensions = array<i32: 1>} : vector<8x128xi32>
    %c32_i32 = arith.constant 32 : i32
    %1 = vector.broadcast %c32_i32 : i32 to vector<8x128xi32>
    %2 = arith.cmpi slt, %0, %1 : vector<8x128xi32>
    %c64_i32 = arith.constant 64 : i32
    %3 = vector.broadcast %c64_i32 : i32 to vector<8x128xi32>
    %4 = arith.cmpi slt, %0, %3 : vector<8x128xi32>
    %cst = arith.constant 1.57079637 : f32
    %cst_0 = arith.constant 0.000000e+00 : f32
    %5 = vector.broadcast %cst : f32 to vector<8x128xf32>
    %6 = vector.broadcast %cst_0 : f32 to vector<8x128xf32>
    %7 = arith.select %4, %5, %6 : vector<8x128xi1>, vector<8x128xf32>
    %c0 = arith.constant 0 : index
    %c0_1 = arith.constant 0 : index
    %8 = vector.load %arg1[%c0, %c0_1] : memref<8x128xf32, #tpu.memory_space<vmem>>, vector<8x128xf32>
    %c0_2 = arith.constant 0 : index
    %c0_3 = arith.constant 0 : index
    %9 = vector.load %arg2[%c0_2, %c0_3] : memref<880x128xf32, #tpu.memory_space<vmem>>, vector<128x128xf32>
    %c128 = arith.constant 128 : index
    %c0_4 = arith.constant 0 : index
    %10 = vector.load %arg2[%c128, %c0_4] : memref<880x128xf32, #tpu.memory_space<vmem>>, vector<1x128xf32>
    %cst_5 = arith.constant dense<0.000000e+00> : vector<8x128xf32>
    %11 = tpu.matmul %8, %9, %cst_5 {dimension_numbers = #tpu.dot_dimension_numbers<[1], [0], [0], [1], [0, 0, 1, 1], [], []>} : vector<8x128xf32>, vector<128x128xf32>, vector<8x128xf32> -> vector<8x128xf32>
    %12 = vector.broadcast %10 : vector<1x128xf32> to vector<8x128xf32>
    %13 = arith.addf %11, %12 : vector<8x128xf32>
    %c136 = arith.constant 136 : index
    %c0_6 = arith.constant 0 : index
    %14 = vector.load %arg2[%c136, %c0_6] : memref<880x128xf32, #tpu.memory_space<vmem>>, vector<1x128xf32>
    %c144 = arith.constant 144 : index
    %c0_7 = arith.constant 0 : index
    %15 = vector.load %arg2[%c144, %c0_7] : memref<880x128xf32, #tpu.memory_space<vmem>>, vector<1x128xf32>
    %cst_8 = arith.constant dense<0.000000e+00> : vector<8xf32>
    %16 = vector.multi_reduction <add>, %13, %cst_8 [1] : vector<8x128xf32> to vector<8xf32>
    %17 = vector.shape_cast %16 : vector<8xf32> to vector<8x1xf32>
    %18 = arith.mulf %13, %13 : vector<8x128xf32>
    %cst_9 = arith.constant dense<0.000000e+00> : vector<8xf32>
    %19 = vector.multi_reduction <add>, %18, %cst_9 [1] : vector<8x128xf32> to vector<8xf32>
    %20 = vector.shape_cast %19 : vector<8xf32> to vector<8x1xf32>
    %cst_10 = arith.constant 3.125000e-02 : f32
    %21 = vector.broadcast %cst_10 : f32 to vector<8x1xf32>
    %22 = arith.mulf %17, %21 : vector<8x1xf32>
    %cst_11 = arith.constant 3.125000e-02 : f32
    %23 = vector.broadcast %cst_11 : f32 to vector<8x1xf32>
    %24 = arith.mulf %20, %23 : vector<8x1xf32>
    %25 = arith.mulf %22, %22 : vector<8x1xf32>
    %26 = arith.subf %24, %25 : vector<8x1xf32>
    %cst_12 = arith.constant 0.000000e+00 : f32
    %27 = vector.broadcast %cst_12 : f32 to vector<8x1xf32>
    %28 = arith.maximumf %26, %27 : vector<8x1xf32>
    %29 = vector.broadcast %22 : vector<8x1xf32> to vector<8x128xf32>
    %30 = arith.subf %13, %29 : vector<8x128xf32>
    %cst_13 = arith.constant 9.99999974E-6 : f32
    %31 = vector.broadcast %cst_13 : f32 to vector<8x1xf32>
    %32 = arith.addf %28, %31 : vector<8x1xf32>
    %33 = math.rsqrt %32 : vector<8x1xf32>
    %34 = vector.broadcast %33 : vector<8x1xf32> to vector<8x128xf32>
    %35 = arith.mulf %30, %34 : vector<8x128xf32>
    %36 = vector.broadcast %14 : vector<1x128xf32> to vector<8x128xf32>
    %37 = arith.mulf %35, %36 : vector<8x128xf32>
    %38 = vector.broadcast %15 : vector<1x128xf32> to vector<8x128xf32>
    %39 = arith.addf %37, %38 : vector<8x128xf32>
    %cst_14 = arith.constant 0.00999999977 : f32
    %40 = vector.broadcast %cst_14 : f32 to vector<8x128xf32>
    %41 = arith.mulf %40, %39 : vector<8x128xf32>
    %42 = arith.maximumf %39, %41 : vector<8x128xf32>
    %c152 = arith.constant 152 : index
    %c0_15 = arith.constant 0 : index
    %43 = vector.load %arg2[%c152, %c0_15] : memref<880x128xf32, #tpu.memory_space<vmem>>, vector<128x128xf32>
    %c280 = arith.constant 280 : index
    %c0_16 = arith.constant 0 : index
    %44 = vector.load %arg2[%c280, %c0_16] : memref<880x128xf32, #tpu.memory_space<vmem>>, vector<1x128xf32>
    %cst_17 = arith.constant dense<0.000000e+00> : vector<8x128xf32>
    %45 = tpu.matmul %42, %43, %cst_17 {dimension_numbers = #tpu.dot_dimension_numbers<[1], [0], [0], [1], [0, 0, 1, 1], [], []>} : vector<8x128xf32>, vector<128x128xf32>, vector<8x128xf32> -> vector<8x128xf32>
    %46 = vector.broadcast %44 : vector<1x128xf32> to vector<8x128xf32>
    %47 = arith.addf %45, %46 : vector<8x128xf32>
    %c288 = arith.constant 288 : index
    %c0_18 = arith.constant 0 : index
    %48 = vector.load %arg2[%c288, %c0_18] : memref<880x128xf32, #tpu.memory_space<vmem>>, vector<1x128xf32>
    %c296 = arith.constant 296 : index
    %c0_19 = arith.constant 0 : index
    %49 = vector.load %arg2[%c296, %c0_19] : memref<880x128xf32, #tpu.memory_space<vmem>>, vector<1x128xf32>
    %cst_20 = arith.constant dense<0.000000e+00> : vector<8xf32>
    %50 = vector.multi_reduction <add>, %47, %cst_20 [1] : vector<8x128xf32> to vector<8xf32>
    %51 = vector.shape_cast %50 : vector<8xf32> to vector<8x1xf32>
    %52 = arith.mulf %47, %47 : vector<8x128xf32>
    %cst_21 = arith.constant dense<0.000000e+00> : vector<8xf32>
    %53 = vector.multi_reduction <add>, %52, %cst_21 [1] : vector<8x128xf32> to vector<8xf32>
    %54 = vector.shape_cast %53 : vector<8xf32> to vector<8x1xf32>
    %cst_22 = arith.constant 3.125000e-02 : f32
    %55 = vector.broadcast %cst_22 : f32 to vector<8x1xf32>
    %56 = arith.mulf %51, %55 : vector<8x1xf32>
    %cst_23 = arith.constant 3.125000e-02 : f32
    %57 = vector.broadcast %cst_23 : f32 to vector<8x1xf32>
    %58 = arith.mulf %54, %57 : vector<8x1xf32>
    %59 = arith.mulf %56, %56 : vector<8x1xf32>
    %60 = arith.subf %58, %59 : vector<8x1xf32>
    %cst_24 = arith.constant 0.000000e+00 : f32
    %61 = vector.broadcast %cst_24 : f32 to vector<8x1xf32>
    %62 = arith.maximumf %60, %61 : vector<8x1xf32>
    %63 = vector.broadcast %56 : vector<8x1xf32> to vector<8x128xf32>
    %64 = arith.subf %47, %63 : vector<8x128xf32>
    %cst_25 = arith.constant 9.99999974E-6 : f32
    %65 = vector.broadcast %cst_25 : f32 to vector<8x1xf32>
    %66 = arith.addf %62, %65 : vector<8x1xf32>
    %67 = math.rsqrt %66 : vector<8x1xf32>
    %68 = vector.broadcast %67 : vector<8x1xf32> to vector<8x128xf32>
    %69 = arith.mulf %64, %68 : vector<8x128xf32>
    %70 = vector.broadcast %48 : vector<1x128xf32> to vector<8x128xf32>
    %71 = arith.mulf %69, %70 : vector<8x128xf32>
    %72 = vector.broadcast %49 : vector<1x128xf32> to vector<8x128xf32>
    %73 = arith.addf %71, %72 : vector<8x128xf32>
    %cst_26 = arith.constant 0.00999999977 : f32
    %74 = vector.broadcast %cst_26 : f32 to vector<8x128xf32>
    %75 = arith.mulf %74, %73 : vector<8x128xf32>
    %76 = arith.maximumf %73, %75 : vector<8x128xf32>
    %c304 = arith.constant 304 : index
    %c0_27 = arith.constant 0 : index
    %77 = vector.load %arg2[%c304, %c0_27] : memref<880x128xf32, #tpu.memory_space<vmem>>, vector<128x128xf32>
    %c432 = arith.constant 432 : index
    %c0_28 = arith.constant 0 : index
    %78 = vector.load %arg2[%c432, %c0_28] : memref<880x128xf32, #tpu.memory_space<vmem>>, vector<1x128xf32>
    %cst_29 = arith.constant dense<0.000000e+00> : vector<8x128xf32>
    %79 = tpu.matmul %76, %77, %cst_29 {dimension_numbers = #tpu.dot_dimension_numbers<[1], [0], [0], [1], [0, 0, 1, 1], [], []>} : vector<8x128xf32>, vector<128x128xf32>, vector<8x128xf32> -> vector<8x128xf32>
    %80 = vector.broadcast %78 : vector<1x128xf32> to vector<8x128xf32>
    %81 = arith.addf %79, %80 : vector<8x128xf32>
    %82 = arith.negf %81 : vector<8x128xf32>
    %83 = math.exp %82 : vector<8x128xf32>
    %cst_30 = arith.constant 1.000000e+00 : f32
    %84 = vector.broadcast %cst_30 : f32 to vector<8x128xf32>
    %85 = arith.addf %84, %83 : vector<8x128xf32>
    %86 = arith.divf %84, %85 : vector<8x128xf32>
    %c440 = arith.constant 440 : index
    %c0_31 = arith.constant 0 : index
    %87 = vector.load %arg2[%c440, %c0_31] : memref<880x128xf32, #tpu.memory_space<vmem>>, vector<128x128xf32>
    %c568 = arith.constant 568 : index
    %c0_32 = arith.constant 0 : index
    %88 = vector.load %arg2[%c568, %c0_32] : memref<880x128xf32, #tpu.memory_space<vmem>>, vector<1x128xf32>
    %cst_33 = arith.constant dense<0.000000e+00> : vector<8x128xf32>
    %89 = tpu.matmul %86, %87, %cst_33 {dimension_numbers = #tpu.dot_dimension_numbers<[1], [0], [0], [1], [0, 0, 1, 1], [], []>} : vector<8x128xf32>, vector<128x128xf32>, vector<8x128xf32> -> vector<8x128xf32>
    %90 = vector.broadcast %88 : vector<1x128xf32> to vector<8x128xf32>
    %91 = arith.addf %89, %90 : vector<8x128xf32>
    %c576 = arith.constant 576 : index
    %c0_34 = arith.constant 0 : index
    %92 = vector.load %arg2[%c576, %c0_34] : memref<880x128xf32, #tpu.memory_space<vmem>>, vector<1x128xf32>
    %c584 = arith.constant 584 : index
    %c0_35 = arith.constant 0 : index
    %93 = vector.load %arg2[%c584, %c0_35] : memref<880x128xf32, #tpu.memory_space<vmem>>, vector<1x128xf32>
    %cst_36 = arith.constant 0.000000e+00 : f32
    %94 = vector.broadcast %cst_36 : f32 to vector<8x128xf32>
    %95 = arith.mulf %91, %91 : vector<8x128xf32>
    %96 = arith.select %2, %91, %94 : vector<8x128xi1>, vector<8x128xf32>
    %cst_37 = arith.constant dense<0.000000e+00> : vector<8xf32>
    %97 = vector.multi_reduction <add>, %96, %cst_37 [1] : vector<8x128xf32> to vector<8xf32>
    %98 = vector.shape_cast %97 : vector<8xf32> to vector<8x1xf32>
    %99 = arith.select %2, %94, %91 : vector<8x128xi1>, vector<8x128xf32>
    %cst_38 = arith.constant dense<0.000000e+00> : vector<8xf32>
    %100 = vector.multi_reduction <add>, %99, %cst_38 [1] : vector<8x128xf32> to vector<8xf32>
    %101 = vector.shape_cast %100 : vector<8xf32> to vector<8x1xf32>
    %102 = arith.select %2, %95, %94 : vector<8x128xi1>, vector<8x128xf32>
    %cst_39 = arith.constant dense<0.000000e+00> : vector<8xf32>
    %103 = vector.multi_reduction <add>, %102, %cst_39 [1] : vector<8x128xf32> to vector<8xf32>
    %104 = vector.shape_cast %103 : vector<8xf32> to vector<8x1xf32>
    %105 = arith.select %2, %94, %95 : vector<8x128xi1>, vector<8x128xf32>
    %cst_40 = arith.constant dense<0.000000e+00> : vector<8xf32>
    %106 = vector.multi_reduction <add>, %105, %cst_40 [1] : vector<8x128xf32> to vector<8xf32>
    %107 = vector.shape_cast %106 : vector<8xf32> to vector<8x1xf32>
    %108 = vector.shape_cast %98 : vector<8x1xf32> to vector<8x1xf32>
    %109 = vector.broadcast %108 : vector<8x1xf32> to vector<8x128xf32>
    %110 = vector.shape_cast %101 : vector<8x1xf32> to vector<8x1xf32>
    %111 = vector.broadcast %110 : vector<8x1xf32> to vector<8x128xf32>
    %112 = arith.select %2, %109, %111 : vector<8x128xi1>, vector<8x128xf32>
    %cst_41 = arith.constant 3.125000e-02 : f32
    %113 = vector.broadcast %cst_41 : f32 to vector<8x128xf32>
    %114 = arith.mulf %112, %113 : vector<8x128xf32>
    %115 = vector.shape_cast %104 : vector<8x1xf32> to vector<8x1xf32>
    %116 = vector.broadcast %115 : vector<8x1xf32> to vector<8x128xf32>
    %117 = vector.shape_cast %107 : vector<8x1xf32> to vector<8x1xf32>
    %118 = vector.broadcast %117 : vector<8x1xf32> to vector<8x128xf32>
    %119 = arith.select %2, %116, %118 : vector<8x128xi1>, vector<8x128xf32>
    %cst_42 = arith.constant 3.125000e-02 : f32
    %120 = vector.broadcast %cst_42 : f32 to vector<8x128xf32>
    %121 = arith.mulf %119, %120 : vector<8x128xf32>
    %122 = arith.mulf %114, %114 : vector<8x128xf32>
    %123 = arith.subf %121, %122 : vector<8x128xf32>
    %cst_43 = arith.constant 0.000000e+00 : f32
    %124 = vector.broadcast %cst_43 : f32 to vector<8x128xf32>
    %125 = arith.maximumf %123, %124 : vector<8x128xf32>
    %126 = arith.subf %91, %114 : vector<8x128xf32>
    %cst_44 = arith.constant 9.99999974E-6 : f32
    %127 = vector.broadcast %cst_44 : f32 to vector<8x128xf32>
    %128 = arith.addf %125, %127 : vector<8x128xf32>
    %129 = math.rsqrt %128 : vector<8x128xf32>
    %130 = arith.mulf %126, %129 : vector<8x128xf32>
    %131 = vector.broadcast %92 : vector<1x128xf32> to vector<8x128xf32>
    %132 = arith.mulf %130, %131 : vector<8x128xf32>
    %133 = vector.broadcast %93 : vector<1x128xf32> to vector<8x128xf32>
    %134 = arith.addf %132, %133 : vector<8x128xf32>
    %cst_45 = arith.constant 0.00999999977 : f32
    %135 = vector.broadcast %cst_45 : f32 to vector<8x128xf32>
    %136 = arith.mulf %135, %134 : vector<8x128xf32>
    %137 = arith.maximumf %134, %136 : vector<8x128xf32>
    %c592 = arith.constant 592 : index
    %c0_46 = arith.constant 0 : index
    %138 = vector.load %arg2[%c592, %c0_46] : memref<880x128xf32, #tpu.memory_space<vmem>>, vector<128x128xf32>
    %c720 = arith.constant 720 : index
    %c0_47 = arith.constant 0 : index
    %139 = vector.load %arg2[%c720, %c0_47] : memref<880x128xf32, #tpu.memory_space<vmem>>, vector<1x128xf32>
    %cst_48 = arith.constant dense<0.000000e+00> : vector<8x128xf32>
    %140 = tpu.matmul %137, %138, %cst_48 {dimension_numbers = #tpu.dot_dimension_numbers<[1], [0], [0], [1], [0, 0, 1, 1], [], []>} : vector<8x128xf32>, vector<128x128xf32>, vector<8x128xf32> -> vector<8x128xf32>
    %141 = vector.broadcast %139 : vector<1x128xf32> to vector<8x128xf32>
    %142 = arith.addf %140, %141 : vector<8x128xf32>
    %c728 = arith.constant 728 : index
    %c0_49 = arith.constant 0 : index
    %143 = vector.load %arg2[%c728, %c0_49] : memref<880x128xf32, #tpu.memory_space<vmem>>, vector<1x128xf32>
    %c736 = arith.constant 736 : index
    %c0_50 = arith.constant 0 : index
    %144 = vector.load %arg2[%c736, %c0_50] : memref<880x128xf32, #tpu.memory_space<vmem>>, vector<1x128xf32>
    %cst_51 = arith.constant 0.000000e+00 : f32
    %145 = vector.broadcast %cst_51 : f32 to vector<8x128xf32>
    %146 = arith.mulf %142, %142 : vector<8x128xf32>
    %147 = arith.select %2, %142, %145 : vector<8x128xi1>, vector<8x128xf32>
    %cst_52 = arith.constant dense<0.000000e+00> : vector<8xf32>
    %148 = vector.multi_reduction <add>, %147, %cst_52 [1] : vector<8x128xf32> to vector<8xf32>
    %149 = vector.shape_cast %148 : vector<8xf32> to vector<8x1xf32>
    %150 = arith.select %2, %145, %142 : vector<8x128xi1>, vector<8x128xf32>
    %cst_53 = arith.constant dense<0.000000e+00> : vector<8xf32>
    %151 = vector.multi_reduction <add>, %150, %cst_53 [1] : vector<8x128xf32> to vector<8xf32>
    %152 = vector.shape_cast %151 : vector<8xf32> to vector<8x1xf32>
    %153 = arith.select %2, %146, %145 : vector<8x128xi1>, vector<8x128xf32>
    %cst_54 = arith.constant dense<0.000000e+00> : vector<8xf32>
    %154 = vector.multi_reduction <add>, %153, %cst_54 [1] : vector<8x128xf32> to vector<8xf32>
    %155 = vector.shape_cast %154 : vector<8xf32> to vector<8x1xf32>
    %156 = arith.select %2, %145, %146 : vector<8x128xi1>, vector<8x128xf32>
    %cst_55 = arith.constant dense<0.000000e+00> : vector<8xf32>
    %157 = vector.multi_reduction <add>, %156, %cst_55 [1] : vector<8x128xf32> to vector<8xf32>
    %158 = vector.shape_cast %157 : vector<8xf32> to vector<8x1xf32>
    %159 = vector.shape_cast %149 : vector<8x1xf32> to vector<8x1xf32>
    %160 = vector.broadcast %159 : vector<8x1xf32> to vector<8x128xf32>
    %161 = vector.shape_cast %152 : vector<8x1xf32> to vector<8x1xf32>
    %162 = vector.broadcast %161 : vector<8x1xf32> to vector<8x128xf32>
    %163 = arith.select %2, %160, %162 : vector<8x128xi1>, vector<8x128xf32>
    %cst_56 = arith.constant 3.125000e-02 : f32
    %164 = vector.broadcast %cst_56 : f32 to vector<8x128xf32>
    %165 = arith.mulf %163, %164 : vector<8x128xf32>
    %166 = vector.shape_cast %155 : vector<8x1xf32> to vector<8x1xf32>
    %167 = vector.broadcast %166 : vector<8x1xf32> to vector<8x128xf32>
    %168 = vector.shape_cast %158 : vector<8x1xf32> to vector<8x1xf32>
    %169 = vector.broadcast %168 : vector<8x1xf32> to vector<8x128xf32>
    %170 = arith.select %2, %167, %169 : vector<8x128xi1>, vector<8x128xf32>
    %cst_57 = arith.constant 3.125000e-02 : f32
    %171 = vector.broadcast %cst_57 : f32 to vector<8x128xf32>
    %172 = arith.mulf %170, %171 : vector<8x128xf32>
    %173 = arith.mulf %165, %165 : vector<8x128xf32>
    %174 = arith.subf %172, %173 : vector<8x128xf32>
    %cst_58 = arith.constant 0.000000e+00 : f32
    %175 = vector.broadcast %cst_58 : f32 to vector<8x128xf32>
    %176 = arith.maximumf %174, %175 : vector<8x128xf32>
    %177 = arith.subf %142, %165 : vector<8x128xf32>
    %cst_59 = arith.constant 9.99999974E-6 : f32
    %178 = vector.broadcast %cst_59 : f32 to vector<8x128xf32>
    %179 = arith.addf %176, %178 : vector<8x128xf32>
    %180 = math.rsqrt %179 : vector<8x128xf32>
    %181 = arith.mulf %177, %180 : vector<8x128xf32>
    %182 = vector.broadcast %143 : vector<1x128xf32> to vector<8x128xf32>
    %183 = arith.mulf %181, %182 : vector<8x128xf32>
    %184 = vector.broadcast %144 : vector<1x128xf32> to vector<8x128xf32>
    %185 = arith.addf %183, %184 : vector<8x128xf32>
    %cst_60 = arith.constant 0.00999999977 : f32
    %186 = vector.broadcast %cst_60 : f32 to vector<8x128xf32>
    %187 = arith.mulf %186, %185 : vector<8x128xf32>
    %188 = arith.maximumf %185, %187 : vector<8x128xf32>
    %c744 = arith.constant 744 : index
    %c0_61 = arith.constant 0 : index
    %189 = vector.load %arg2[%c744, %c0_61] : memref<880x128xf32, #tpu.memory_space<vmem>>, vector<128x128xf32>
    %c872 = arith.constant 872 : index
    %c0_62 = arith.constant 0 : index
    %190 = vector.load %arg2[%c872, %c0_62] : memref<880x128xf32, #tpu.memory_space<vmem>>, vector<1x128xf32>
    %cst_63 = arith.constant dense<0.000000e+00> : vector<8x128xf32>
    %191 = tpu.matmul %188, %189, %cst_63 {dimension_numbers = #tpu.dot_dimension_numbers<[1], [0], [0], [1], [0, 0, 1, 1], [], []>} : vector<8x128xf32>, vector<128x128xf32>, vector<8x128xf32> -> vector<8x128xf32>
    %192 = vector.broadcast %190 : vector<1x128xf32> to vector<8x128xf32>
    %193 = arith.addf %191, %192 : vector<8x128xf32>
    %194 = arith.negf %193 : vector<8x128xf32>
    %195 = math.exp %194 : vector<8x128xf32>
    %cst_64 = arith.constant 1.000000e+00 : f32
    %196 = vector.broadcast %cst_64 : f32 to vector<8x128xf32>
    %197 = arith.addf %196, %195 : vector<8x128xf32>
    %198 = arith.divf %196, %197 : vector<8x128xf32>
    %c64_i32_65 = arith.constant 64 : i32
    %199 = tpu.dynamic_rotate %198 by %c64_i32_65 dim 1 : vector<8x128xf32>, i32 -> vector<8x128xf32>
    %200 = arith.select %4, %198, %199 : vector<8x128xi1>, vector<8x128xf32>
    %201 = arith.select %4, %199, %198 : vector<8x128xi1>, vector<8x128xf32>
    %cst_66 = arith.constant 6.28318548 : f32
    %202 = vector.broadcast %cst_66 : f32 to vector<8x128xf32>
    %203 = arith.mulf %202, %201 : vector<8x128xf32>
    %204 = arith.addf %203, %7 : vector<8x128xf32>
    %205 = math.sin %204 : vector<8x128xf32>
    %206 = arith.mulf %200, %205 : vector<8x128xf32>
    %c0_67 = arith.constant 0 : index
    %c0_68 = arith.constant 0 : index
    %207 = vector.load %arg3[%c0_67, %c0_68] : memref<8x128xf32, #tpu.memory_space<vmem>>, vector<8x128xf32>
    tpu.vector_store %arg3[%c0_67, %c0_68], %206 {strides = array<i32>} : memref<8x128xf32, #tpu.memory_space<vmem>>, vector<8x128xf32>,
    return
  }
  func.func @transform_0(%arg0: i32) -> (i32, i32) {
    %c0_i32 = arith.constant 0 : i32
    %c0_i32_0 = arith.constant 0 : i32
    return %arg0, %c0_i32 : i32, i32
  }
  func.func @transform_1(%arg0: i32) -> (i32, i32) {
    %c0_i32 = arith.constant 0 : i32
    %c0_i32_0 = arith.constant 0 : i32
    %c0_i32_1 = arith.constant 0 : i32
    return %c0_i32, %c0_i32_0 : i32, i32
  }
  func.func @transform_2(%arg0: i32) -> (i32, i32) {
    %c0_i32 = arith.constant 0 : i32
    %c0_i32_0 = arith.constant 0 : i32
    return %arg0, %c0_i32 : i32, i32
  }
}

</mosaic_0001>

<bundles_post_ra>
// kernel: _forward_packed.1
= control target key start
LH: loop header
LB: loop body
LE: loop exit
PB: predicated region body
PF: predicated region fallthrough
CT: control target
= control target key end

     0   :  { %7 = vsyncpa [#allocation3], 0  ;;  %s1667_s0 = inlined_call_operand.hbm [shape: f32[8,128], index: 0, kind: input, shape index: {}]   ;;  %s1668_s1 = inlined_call_operand.hbm [shape: f32[880,128], index: 1, kind: input, shape index: {}]   ;;  %s1669_s2 = inlined_call_operand.hbm [shape: f32[8,128], index: 2, kind: output, shape index: {}]  }
   0x1   :  { %8 = vsyncpa [#allocation6], 0 }
   0x2   :  { %9 = vsyncpa [#allocation4], 0  ;;  %s1449_s9 = smov [#allocation2]   ;;  %s1450_s11 = smov [#allocation5]  }
   0x3   :  { %s16_s10 = sshll.u32 %s1449_s9, 4  ;;  %s25_s12 = sshll.u32 %s1450_s11, 4  ;;  %s17_s10 = int_to_ptr.vmem [resolvable:$true] %s16_s10  ;;  %s1479_s12 = int_to_ptr.vmem [resolvable:$true] %s25_s12 }
   0x4   :  { %s1377_s15 = scalar_lea.hbm %s1667_s0, 128 }
   0x5   :  { %p1378_p0 = scmp.ne.s32.totalorder %s1667_s0, %s1377_s15  ;;  %p1381_p1 = scmp.lt.u32.totalorder %s1377_s15, %s1667_s0 }
   0x7   :  { %p1383_p2 = pnand %p1381_p1, %p1378_p0 }
   0x9   :  { %1386 = shalt.err (!%p1383_p2)
}
   0xa   :  { %s1387_s20 = scalar_lea.vmem %s17_s10, 128  ;;  %p1392_p4 = scmp.lt.s32.totalorder %s17_s10, %s17_s10 }
   0xb   :  { %p1388_p3 = scmp.ne.s32.totalorder %s17_s10, %s1387_s20  ;;  %p1393_p5 = scmp.lt.s32.totalorder %s1387_s20, %s1387_s20 }
   0xd   :  { %p1394_p6 = por %p1393_p5, %p1392_p4 }
   0xf   :  { %p1395_p7 = pnand %p1394_p6, %p1388_p3 }
  0x11   :  { %1398 = shalt.err (!%p1395_p7)
}
  0x12   :  { %19 = dma.hbm_to_vmem [thread:$0]  %s1667_s0, 128, %s17_s10, [#allocation3]  }
  0x13   :  { %s1399_s25 = scalar_lea.hbm %s1668_s1, 14080 }
  0x14   :  { %p1400_p8 = scmp.ne.s32.totalorder %s1668_s1, %s1399_s25  ;;  %p1403_p9 = scmp.lt.u32.totalorder %s1399_s25, %s1668_s1 }
  0x16   :  { %p1405_p10 = pnand %p1403_p9, %p1400_p8 }
  0x18   :  { %1408 = shalt.err (!%p1405_p10)
}
  0x19   :  { %s1409_s30 = scalar_lea.vmem %s1479_s12, 14080  ;;  %p1414_p12 = scmp.lt.s32.totalorder %s1479_s12, %s1479_s12 }
  0x1a   :  { %p1410_p11 = scmp.ne.s32.totalorder %s1479_s12, %s1409_s30  ;;  %p1415_p13 = scmp.lt.s32.totalorder %s1409_s30, %s1409_s30 }
  0x1c   :  { %p1416_p0 = por %p1415_p13, %p1414_p12 }
  0x1e   :  { %p1417_p1 = pnand %p1416_p0, %p1410_p11 }
  0x20   :  { %1420 = shalt.err (!%p1417_p1)
}
  0x21   :  { %s1451_s0 = smov 128   ;;  %s1452_s3 = smov 8  }
  0x22   :  { %31 = dma.hbm_to_vmem [thread:$0]  %s1668_s1, 14080, %s1479_s12, [#allocation6], %s1451_s0, %s1451_s0, %s1452_s3  }
  0x23   :  { %1443 = dma.done.wait [#allocation3], 128  }
  0x24   :  { %1444 = vsyncadd [#allocation3], 4294967168 }
  0x25   :  { %1445 = dma.done.wait [#allocation6], 14080  }
  0x26   :  { %1446 = vsyncadd [#allocation6], 4294953216  ;;  %v1453_v0 = vmov 0.0|0.0   ;;  %vm1454_vm0 = vmmov 0   ;;  %v1455_v1 = vmov 0.0   ;;  %v44_v2 = vld [vmem:[#allocation5] sm:$0xff] }
  0x27   :  { %1194 = vmatprep.subr.bf16.mxu0 %v1453_v0  ;;  %1016 = vmatprep.mubr.msk.f32.mxu0 %vm1454_vm0, %v1455_v1  ;;  %v45_v3 = vld [vmem:[#allocation5 + $0x8] sm:$0xff]  ;;  %v46_v4 = vld [vmem:[#allocation5 + $0x10] sm:$0xff]  ;;  %v47_v6 = vld [vmem:[#allocation5 + $0x18] sm:$0xff]  ;;  %s1456_s1 = smov 64   ;;  %s1463_s6 = smov [#allocation7]  }
  0x28   :  { %1218 = vmatprep.subr.bf16.mxu1 %v1453_v0  ;;  %1051 = vmatprep.mubr.msk.f32.mxu1 %vm1454_vm0, %v1455_v1  ;;  %v1195_v5 = vpack.c.bf16 %v45_v3, %v44_v2  ;;  %v1198_v7 = vpack.c.bf16 %v47_v6, %v46_v4  ;;  %v48_v8 = vld [vmem:[#allocation5 + $0x20] sm:$0xff]  ;;  %v49_v9 = vld [vmem:[#allocation5 + $0x28] sm:$0xff]  ;;  %v50_v11 = vld [vmem:[#allocation5 + $0x30] sm:$0xff]  ;;  %s852_s7 = sshll.u32 %s1463_s6, 4  ;;  %s853_s7 = int_to_ptr.vmem [resolvable:$true] %s852_s7 }
  0x29   :  { %v1201_v10 = vpack.c.bf16 %v49_v9, %v48_v8  ;;  %v51_v12 = vld [vmem:[#allocation5 + $0x38] sm:$0xff]  ;;  %v52_v14 = vld [vmem:[#allocation5 + $0x40] sm:$0xff]  ;;  %v53_v15 = vld [vmem:[#allocation5 + $0x48] sm:$0xff]  ;;  %s1421_s8 = scalar_lea.vmem %s853_s7, 128  ;;  %p1426_p3 = scmp.lt.s32.totalorder %s853_s7, %s853_s7 }
  0x2a   :  { %1196 = vmatpush3.bf16.msra.mxu0 %v1195_v5  ;;  %v1204_v13 = vpack.c.bf16 %v51_v12, %v50_v11  ;;  %v1207_v16 = vpack.c.bf16 %v53_v15, %v52_v14  ;;  %v54_v17 = vld [vmem:[#allocation5 + $0x50] sm:$0xff]  ;;  %v55_v18 = vld [vmem:[#allocation5 + $0x58] sm:$0xff]  ;;  %v56_v20 = vld [vmem:[#allocation5 + $0x60] sm:$0xff]  ;;  %p1422_p2 = scmp.ne.s32.totalorder %s853_s7, %s1421_s8  ;;  %p1427_p4 = scmp.lt.s32.totalorder %s1421_s8, %s1421_s8 }
  0x2b   :  { %1197 = vmatprep.subr.bf16.mxu0 %v1453_v0  ;;  %v1210_v19 = vpack.c.bf16 %v55_v18, %v54_v17  ;;  %v57_v21 = vld [vmem:[#allocation5 + $0x68] sm:$0xff]  ;;  %v58_v23 = vld [vmem:[#allocation5 + $0x70] sm:$0xff]  ;;  %v59_v24 = vld [vmem:[#allocation5 + $0x78] sm:$0xff] }
  0x2c   :  { %v1213_v22 = vpack.c.bf16 %v57_v21, %v56_v20  ;;  %v1216_v25 = vpack.c.bf16 %v59_v24, %v58_v23  ;;  %v43_v26 = vld [vmem:[#allocation2] sm:$0xff]  ;;  %v862_v27 = vld [vmem:[#allocation5 + $0x80] ss:$0 sm:$0xff]  ;;  %v165_v35 = vld [vmem:[#allocation5 + $0xa8] sm:$0xff]  ;;  %p1428_p5 = por %p1427_p4, %p1426_p3 }
  0x2d   :  { %v163_v32 = vld [vmem:[#allocation5 + $0x98] sm:$0xff]  ;;  %v164_v33 = vld [vmem:[#allocation5 + $0xa0] sm:$0xff]  ;;  %v166_v36 = vld [vmem:[#allocation5 + $0xb0] sm:$0xff] }
  0x2e   :  { %1199 = vmatpush3.bf16.msra.mxu0 %v1198_v7  ;;  %v1219_v34 = vpack.c.bf16 %v164_v33, %v163_v32  ;;  %v1222_v37 = vpack.c.bf16 %v166_v36, %v165_v35  ;;  %v167_v38 = vld [vmem:[#allocation5 + $0xb8] sm:$0xff]  ;;  %v168_v39 = vld [vmem:[#allocation5 + $0xc0] sm:$0xff]  ;;  %v169_v41 = vld [vmem:[#allocation5 + $0xc8] sm:$0xff]  ;;  %p1429_p6 = pnand %p1428_p5, %p1422_p2 }
  0x2f   :  { %1200 = vmatprep.subr.bf16.mxu0 %v1453_v0  ;;  %v1225_v40 = vpack.c.bf16 %v168_v39, %v167_v38  ;;  %v170_v42 = vld [vmem:[#allocation5 + $0xd0] sm:$0xff]  ;;  %v171_v44 = vld [vmem:[#allocation5 + $0xd8] sm:$0xff]  ;;  %v172_v45 = vld [vmem:[#allocation5 + $0xe0] sm:$0xff] }
  0x30   :  { %1220 = vmatpush3.bf16.msra.mxu1 %v1219_v34  ;;  %v1228_v43 = vpack.c.bf16 %v170_v42, %v169_v41  ;;  %v1231_v46 = vpack.c.bf16 %v172_v45, %v171_v44  ;;  %v173_v47 = vld [vmem:[#allocation5 + $0xe8] sm:$0xff]  ;;  %v174_v48 = vld [vmem:[#allocation5 + $0xf0] sm:$0xff]  ;;  %v175_v50 = vld [vmem:[#allocation5 + $0xf8] sm:$0xff] }
  0x31   :  { %1221 = vmatprep.subr.bf16.mxu1 %v1453_v0  ;;  %v1234_v49 = vpack.c.bf16 %v174_v48, %v173_v47  ;;  %v176_v51 = vld [vmem:[#allocation5 + $0x100] sm:$0xff]  ;;  %v177_v53 = vld [vmem:[#allocation5 + $0x108] sm:$0xff]  ;;  %v178_v54 = vld [vmem:[#allocation5 + $0x110] sm:$0xff] }
  0x32   :  { %1202 = vmatpush3.bf16.msra.mxu0 %v1201_v10  ;;  %v1237_v52 = vpack.c.bf16 %v176_v51, %v175_v50  ;;  %v1240_v55 = vpack.c.bf16 %v178_v54, %v177_v53  ;;  %v863_v4 = vld [vmem:[#allocation5 + $0x88] ss:$0 sm:$0xff]  ;;  %v864_v6 = vld [vmem:[#allocation5 + $0x90] ss:$0 sm:$0xff]  ;;  %v865_v11 = vld [vmem:[#allocation5 + $0x118] ss:$0 sm:$0xff] }
  0x33   :  { %1203 = vmatprep.subr.bf16.mxu0 %v1453_v0  ;;  %v283_v17 = vld [vmem:[#allocation5 + $0x138] sm:$0xff]  ;;  %v285_v20 = vld [vmem:[#allocation5 + $0x148] sm:$0xff]  ;;  %v294_v34 = vld [vmem:[#allocation5 + $0x190] sm:$0xff] }
  0x34   :  { %1223 = vmatpush3.bf16.msra.mxu1 %v1222_v37  ;;  %v287_v23 = vld [vmem:[#allocation5 + $0x158] sm:$0xff]  ;;  %v293_v32 = vld [vmem:[#allocation5 + $0x188] sm:$0xff]  ;;  %v296_v37 = vld [vmem:[#allocation5 + $0x1a0] sm:$0xff] }
  0x35   :  { %1224 = vmatprep.subr.bf16.mxu1 %v1453_v0  ;;  %v295_v35 = vld [vmem:[#allocation5 + $0x198] sm:$0xff]  ;;  %v297_v38 = vld [vmem:[#allocation5 + $0x1a8] sm:$0xff]  ;;  %v380_v41 = vld [vmem:[#allocation5 + $0x1c0] sm:$0xff] }
  0x36   :  { %1205 = vmatpush3.bf16.msra.mxu0 %v1204_v13  ;;  %v1261_v36 = vpack.c.bf16 %v295_v35, %v294_v34  ;;  %v1264_v39 = vpack.c.bf16 %v297_v38, %v296_v37  ;;  %v866_v53 = vld [vmem:[#allocation5 + $0x120] ss:$0 sm:$0xff]  ;;  %v508_v38 = vld [vmem:[#allocation5 + $0x250] sm:$0xff] }
  0x37   :  { %1206 = vmatprep.subr.bf16.mxu0 %v1453_v0 }
  0x38   :  { %1226 = vmatpush3.bf16.msra.mxu1 %v1225_v40  ;;  %v379_v40 = vld [vmem:[#allocation5 + $0x1b8] sm:$0xff] }
  0x39   :  { %1227 = vmatprep.subr.bf16.mxu1 %v1453_v0  ;;  %v1267_v42 = vpack.c.bf16 %v380_v41, %v379_v40  ;;  %v510_v41 = vld [vmem:[#allocation5 + $0x260] sm:$0xff] }
  0x3a   :  { %1208 = vmatpush3.bf16.msra.mxu0 %v1207_v16  ;;  %v282_v16 = vld [vmem:[#allocation5 + $0x130] sm:$0xff] }
  0x3b   :  { %1209 = vmatprep.subr.bf16.mxu0 %v1453_v0  ;;  %v1243_v18 = vpack.c.bf16 %v283_v17, %v282_v16  ;;  %v393_v16 = vld [vmem:[#allocation5 + $0x228] sm:$0xff]  ;;  %v394_v17 = vld [vmem:[#allocation5 + $0x230] sm:$0xff] }
  0x3c   :  { %1229 = vmatpush3.bf16.msra.mxu1 %v1228_v43 }
  0x3d   :  { %1230 = vmatprep.subr.bf16.mxu1 %v1453_v0 }
  0x3e   :  { %1211 = vmatpush3.bf16.msra.mxu0 %v1210_v19  ;;  %v284_v19 = vld [vmem:[#allocation5 + $0x140] sm:$0xff] }
  0x3f   :  { %1212 = vmatprep.subr.bf16.mxu0 %v1453_v0  ;;  %v1246_v21 = vpack.c.bf16 %v285_v20, %v284_v19  ;;  %v868_v19 = vld [vmem:[#allocation5 + $0x1b0] ss:$0 sm:$0xff] }
  0x40   :  { %1232 = vmatpush3.bf16.msra.mxu1 %v1231_v46 }
  0x41   :  { %1233 = vmatprep.subr.bf16.mxu1 %v1453_v0 }
  0x42   :  { %1214 = vmatpush3.bf16.msra.mxu0 %v1213_v22  ;;  %v286_v22 = vld [vmem:[#allocation5 + $0x150] sm:$0xff] }
  0x43   :  { %1215 = vmatprep.subr.bf16.mxu0 %v1453_v0  ;;  %v1249_v24 = vpack.c.bf16 %v287_v23, %v286_v22 }
  0x44   :  { %1235 = vmatpush3.bf16.msra.mxu1 %v1234_v49 }
  0x45   :  { %1236 = vmatprep.subr.bf16.mxu1 %v1453_v0 }
  0x46   :  { %1217 = vmatpush3.bf16.msra.mxu0 %v1216_v25  ;;  %v288_v25 = vld [vmem:[#allocation5 + $0x160] sm:$0xff] }
  0x47   :  { %1242 = vmatprep.subr.bf16.mxu0 %v1453_v0 }
  0x48   :  { %1238 = vmatpush3.bf16.msra.mxu1 %v1237_v52 }
  0x49   :  { %1017 = vmatmul.mubr.f32.vlgmr.msra.gmra.mrb[0].mxu0 %v43_v26  ;;  %1239 = vmatprep.subr.bf16.mxu1 %v1453_v0  ;;  %v289_v26 = vld [vmem:[#allocation5 + $0x168] sm:$0xff] }
  0x4a   :  { %1086 = vmatprep.mubr.msk.f32.mxu0 %vm1454_vm0, %v1455_v1  ;;  %1244 = vmatpush3.bf16.msra.mxu0 %v1243_v18  ;;  %v1288_v18 = vpack.c.bf16 %v394_v17, %v393_v16  ;;  %v872_v16 = vld [vmem:[#allocation5 + $0x248] ss:$0 sm:$0xff] }
  0x4b   :  { %1245 = vmatprep.subr.bf16.mxu0 %v1453_v0 }
  0x4c   :  { %1241 = vmatpush3.bf16.msra.mxu1 %v1240_v55  ;;  %v867_v55 = vld [vmem:[#allocation5 + $0x128] ss:$0 sm:$0xff] }
  0x4d   :  { %1266 = vmatprep.subr.bf16.mxu1 %v1453_v0 }
  0x4e   :  { %1247 = vmatpush3.bf16.msra.mxu0 %v1246_v21 }
  0x4f   :  { %1248 = vmatprep.subr.bf16.mxu0 %v1453_v0 }
  0x52   :  { %1250 = vmatpush3.bf16.msra.mxu0 %v1249_v24 }
  0x53   :  { %1251 = vmatprep.subr.bf16.mxu0 %v1453_v0 }
 0x11c   :  { %v131_v28 = vpop.f32.mrb[0].mxu0 }
 0x11d   :  { %v132_v29 = vadd.f32 %v862_v27, %v131_v28  ;;  %v1018_v30 = vpop.f32.mrb[1].mxu0  ;;  %v1252_v27 = vpack.c.bf16 %v289_v26, %v288_v25  ;;  %v290_v28 = vld [vmem:[#allocation5 + $0x170] sm:$0xff] }
 0x11f   :  { %137 = vadd.xlane.f32.xlu0 %v132_v29  ;;  %v139_v31 = vmul.f32 %v132_v29, %v132_v29  ;;  %1253 = vmatpush3.bf16.msra.mxu0 %v1252_v27  ;;  %v38_v27 = vlaneseq }
 0x120   :  { %1254 = vmatprep.subr.bf16.mxu0 %v1453_v0 }
 0x123   :  { %140 = vadd.xlane.f32.xlu0 %v139_v31  ;;  %v292_v31 = vld [vmem:[#allocation5 + $0x180] sm:$0xff] }
 0x124   :  { %v1258_v33 = vpack.c.bf16 %v293_v32, %v292_v31 }
 0x1ac   :  { %v138_v56 = vpop.xlane.xlu0 %137 }
 0x1ad   :  { %v142_v57 = vmul.f32 0.03125, %v138_v56 }
 0x1af   :  { %v144_v59 = vmul.f32 %v142_v57, %v142_v57  ;;  %v147_v2 = vsub.f32 %v132_v29, %v142_v57  ;;  %v291_v29 = vld [vmem:[#allocation5 + $0x178] sm:$0xff] }
 0x1b0   :  { %v141_v58 = vpop.xlane.xlu0 %140  ;;  %v1255_v30 = vpack.c.bf16 %v291_v29, %v290_v28  ;;  %v1562_v28 = vand.u32 127, %v38_v27  ;;  %v870_v29 = vld [vmem:[#allocation5 + $0x238] ss:$0 sm:$0xff] }
 0x1b1   :  { %v143_v60 = vmul.f32 0.03125, %v141_v58 }
 0x1b2   :  { %1256 = vmatpush3.bf16.msra.mxu0 %v1255_v30  ;;  %vm40_vm1 = vcmp.lt.s32.totalorder %v1562_v28, 32  ;;  %vm41_vm2 = vcmp.lt.s32.totalorder %v1562_v28, 64 }
 0x1b3   :  { %v145_v61 = vsub.f32 %v143_v60, %v144_v59  ;;  %1257 = vmatprep.subr.bf16.mxu0 %v1453_v0  ;;  %v381_v60 = vld [vmem:[#allocation5 + $0x1c8] sm:$0xff] }
 0x1b5   :  { %v146_v62 = vmax.f32 %v145_v61, 0.0  ;;  %v382_v61 = vld [vmem:[#allocation5 + $0x1d0] sm:$0xff] }
 0x1b6   :  { %1259 = vmatpush3.bf16.msra.mxu0 %v1258_v33 }
 0x1b7   :  { %v148_v63 = vadd.f32 1e-05, %v146_v62  ;;  %1260 = vmatprep.subr.bf16.mxu0 %v1453_v0  ;;  %v1270_v62 = vpack.c.bf16 %v382_v61, %v381_v60  ;;  %v523_v60 = vld [vmem:[#allocation5 + $0x2c8] sm:$0xff] }
 0x1b9   :  { %1357 = vrsqrt.f32 %v148_v63  ;;  %v383_v63 = vld [vmem:[#allocation5 + $0x1d8] sm:$0xff] }
 0x1ba   :  { %1262 = vmatpush3.bf16.msra.mxu0 %v1261_v36 }
 0x1bb   :  { %1263 = vmatprep.subr.bf16.mxu0 %v1453_v0 }
 0x1be   :  { %1265 = vmatpush3.bf16.msra.mxu0 %v1264_v39  ;;  %v509_v39 = vld [vmem:[#allocation5 + $0x258] sm:$0xff] }
 0x1bf   :  { %1290 = vmatprep.subr.bf16.mxu0 %v1453_v0  ;;  %v1291_v40 = vpack.c.bf16 %v509_v39, %v508_v38  ;;  %v642_v38 = vld [vmem:[#allocation5 + $0x310] sm:$0xff] }
 0x1c3   :  { %v1358_v3 = vpop.eup %1357 }
 0x1c4   :  { %v150_v5 = vmul.f32 %v1358_v3, %v147_v2  ;;  %v384_v2 = vld [vmem:[#allocation5 + $0x1e0] sm:$0xff] }
 0x1c5   :  { %v1273_v3 = vpack.c.bf16 %v384_v2, %v383_v63 }
 0x1c6   :  { %v155_v7 = vmul.f32 %v863_v4, %v150_v5  ;;  %v385_v4 = vld [vmem:[#allocation5 + $0x1e8] sm:$0xff]  ;;  %v386_v5 = vld [vmem:[#allocation5 + $0x1f0] sm:$0xff] }
 0x1c8   :  { %v160_v8 = vadd.f32 %v864_v6, %v155_v7  ;;  %v1276_v6 = vpack.c.bf16 %v386_v5, %v385_v4  ;;  %v387_v7 = vld [vmem:[#allocation5 + $0x1f8] sm:$0xff] }
 0x1ca   :  { %v161_v9 = vmul.f32 0.01, %v160_v8 }
 0x1cc   :  { %v162_v10 = vmax.f32 %v160_v8, %v161_v9  ;;  %v388_v8 = vld [vmem:[#allocation5 + $0x200] sm:$0xff] }
 0x1cd   :  { %v1279_v9 = vpack.c.bf16 %v388_v8, %v387_v7 }
 0x1ce   :  { %1052 = vmatmul.mubr.f32.vlgmr.msra.gmra.mrb[0].mxu1 %v162_v10  ;;  %v389_v10 = vld [vmem:[#allocation5 + $0x208] sm:$0xff] }
 0x1cf   :  { %1121 = vmatprep.mubr.msk.f32.mxu1 %vm1454_vm0, %v1455_v1  ;;  %1268 = vmatpush3.bf16.msra.mxu1 %v1267_v42  ;;  %v511_v42 = vld [vmem:[#allocation5 + $0x268] sm:$0xff] }
 0x1d0   :  { %1269 = vmatprep.subr.bf16.mxu1 %v1453_v0 }
 0x1d3   :  { %1271 = vmatpush3.bf16.msra.mxu1 %v1270_v62 }
 0x1d4   :  { %1272 = vmatprep.subr.bf16.mxu1 %v1453_v0 }
 0x1d7   :  { %1274 = vmatpush3.bf16.msra.mxu1 %v1273_v3 }
 0x1d8   :  { %1275 = vmatprep.subr.bf16.mxu1 %v1453_v0 }
 0x1db   :  { %1277 = vmatpush3.bf16.msra.mxu1 %v1276_v6 }
 0x1dc   :  { %1278 = vmatprep.subr.bf16.mxu1 %v1453_v0 }
 0x1df   :  { %1280 = vmatpush3.bf16.msra.mxu1 %v1279_v9 }
 0x1e0   :  { %1281 = vmatprep.subr.bf16.mxu1 %v1453_v0 }
 0x2a1   :  { %v250_v12 = vpop.f32.mrb[0].mxu1 }
 0x2a2   :  { %v1536_v13 = vadd.f32 %v865_v11, %v250_v12  ;;  %v1053_v14 = vpop.f32.mrb[1].mxu1  ;;  %v390_v11 = vld [vmem:[#allocation5 + $0x210] sm:$0xff] }
 0x2a3   :  { %v1282_v12 = vpack.c.bf16 %v390_v11, %v389_v10  ;;  %v392_v14 = vld [vmem:[#allocation5 + $0x220] sm:$0xff] }
 0x2a4   :  { %256 = vadd.xlane.f32.xlu1 %v1536_v13  ;;  %v258_v15 = vmul.f32 %v1536_v13, %v1536_v13 }
 0x2a5   :  { %1283 = vmatpush3.bf16.msra.mxu1 %v1282_v12 }
 0x2a6   :  { %1284 = vmatprep.subr.bf16.mxu1 %v1453_v0 }
 0x2a8   :  { %259 = vadd.xlane.f32.xlu1 %v258_v15 }
 0x331   :  { %v257_v43 = vpop.xlane.xlu1 %256 }
 0x332   :  { %v261_v44 = vmul.f32 0.03125, %v257_v43  ;;  %v1294_v43 = vpack.c.bf16 %v511_v42, %v510_v41  ;;  %v644_v41 = vld [vmem:[#allocation5 + $0x320] sm:$0xff] }
 0x334   :  { %v263_v46 = vmul.f32 %v261_v44, %v261_v44  ;;  %v266_v51 = vsub.f32 %v1536_v13, %v261_v44  ;;  %v391_v13 = vld [vmem:[#allocation5 + $0x218] sm:$0xff]  ;;  %v512_v44 = vld [vmem:[#allocation5 + $0x270] sm:$0xff] }
 0x335   :  { %v260_v45 = vpop.xlane.xlu1 %259  ;;  %v1285_v15 = vpack.c.bf16 %v392_v14, %v391_v13  ;;  %v871_v14 = vld [vmem:[#allocation5 + $0x240] ss:$0 sm:$0xff] }
 0x336   :  { %v262_v47 = vmul.f32 0.03125, %v260_v45  ;;  %v513_v45 = vld [vmem:[#allocation5 + $0x278] sm:$0xff] }
 0x337   :  { %1286 = vmatpush3.bf16.msra.mxu1 %v1285_v15 }
 0x338   :  { %v264_v48 = vsub.f32 %v262_v47, %v263_v46  ;;  %1287 = vmatprep.subr.bf16.mxu1 %v1453_v0  ;;  %v1297_v46 = vpack.c.bf16 %v513_v45, %v512_v44  ;;  %v514_v47 = vld [vmem:[#allocation5 + $0x280] sm:$0xff]  ;;  %v646_v44 = vld [vmem:[#allocation5 + $0x330] sm:$0xff] }
 0x33a   :  { %v265_v49 = vmax.f32 %v264_v48, 0.0  ;;  %v515_v48 = vld [vmem:[#allocation5 + $0x288] sm:$0xff] }
 0x33b   :  { %1289 = vmatpush3.bf16.msra.mxu1 %v1288_v18 }
 0x33c   :  { %v267_v50 = vadd.f32 1e-05, %v265_v49  ;;  %1314 = vmatprep.subr.bf16.mxu1 %v1453_v0  ;;  %v1300_v49 = vpack.c.bf16 %v515_v48, %v514_v47  ;;  %v648_v47 = vld [vmem:[#allocation5 + $0x340] sm:$0xff] }
 0x33e   :  { %1359 = vrsqrt.f32 %v267_v50  ;;  %v516_v50 = vld [vmem:[#allocation5 + $0x290] sm:$0xff] }
 0x348   :  { %v1360_v52 = vpop.eup %1359 }
 0x349   :  { %v269_v54 = vmul.f32 %v1360_v52, %v266_v51  ;;  %v517_v51 = vld [vmem:[#allocation5 + $0x298] sm:$0xff] }
 0x34a   :  { %v1303_v52 = vpack.c.bf16 %v517_v51, %v516_v50  ;;  %v650_v50 = vld [vmem:[#allocation5 + $0x350] sm:$0xff] }
 0x34b   :  { %v274_v56 = vmul.f32 %v866_v53, %v269_v54  ;;  %v518_v53 = vld [vmem:[#allocation5 + $0x2a0] sm:$0xff]  ;;  %v519_v54 = vld [vmem:[#allocation5 + $0x2a8] sm:$0xff] }
 0x34d   :  { %v279_v57 = vadd.f32 %v867_v55, %v274_v56  ;;  %v1306_v55 = vpack.c.bf16 %v519_v54, %v518_v53  ;;  %v520_v56 = vld [vmem:[#allocation5 + $0x2b0] sm:$0xff]  ;;  %v652_v53 = vld [vmem:[#allocation5 + $0x360] sm:$0xff] }
 0x34f   :  { %v280_v58 = vmul.f32 0.01, %v279_v57 }
 0x351   :  { %v281_v59 = vmax.f32 %v279_v57, %v280_v58  ;;  %v521_v57 = vld [vmem:[#allocation5 + $0x2b8] sm:$0xff] }
 0x352   :  { %v1309_v58 = vpack.c.bf16 %v521_v57, %v520_v56 }
 0x353   :  { %1087 = vmatmul.mubr.f32.vlgmr.msra.gmra.mrb[2].mxu0 %v281_v59  ;;  %v522_v59 = vld [vmem:[#allocation5 + $0x2c0] sm:$0xff] }
 0x354   :  { %1156 = vmatprep.mubr.msk.f32.mxu0 %vm1454_vm0, %v1455_v1  ;;  %1292 = vmatpush3.bf16.msra.mxu0 %v1291_v40  ;;  %v1312_v61 = vpack.c.bf16 %v523_v60, %v522_v59  ;;  %v643_v40 = vld [vmem:[#allocation5 + $0x318] sm:$0xff] }
 0x355   :  { %1293 = vmatprep.subr.bf16.mxu0 %v1453_v0  ;;  %v1324_v42 = vpack.c.bf16 %v644_v41, %v643_v40  ;;  %v1459_v41 = vmov 2131351028  }
 0x358   :  { %1295 = vmatpush3.bf16.msra.mxu0 %v1294_v43  ;;  %v645_v43 = vld [vmem:[#allocation5 + $0x328] sm:$0xff] }
 0x359   :  { %1296 = vmatprep.subr.bf16.mxu0 %v1453_v0  ;;  %v1327_v45 = vpack.c.bf16 %v646_v44, %v645_v43  ;;  %v1460_v44 = vmov 2102212464  }
 0x35c   :  { %1298 = vmatpush3.bf16.msra.mxu0 %v1297_v46  ;;  %v647_v46 = vld [vmem:[#allocation5 + $0x338] sm:$0xff] }
 0x35d   :  { %1299 = vmatprep.subr.bf16.mxu0 %v1453_v0  ;;  %v1330_v48 = vpack.c.bf16 %v648_v47, %v647_v46  ;;  %v1461_v47 = vmov 920167782  }
 0x360   :  { %1301 = vmatpush3.bf16.msra.mxu0 %v1300_v49  ;;  %v649_v49 = vld [vmem:[#allocation5 + $0x348] sm:$0xff] }
 0x361   :  { %1302 = vmatprep.subr.bf16.mxu0 %v1453_v0  ;;  %v1333_v51 = vpack.c.bf16 %v650_v50, %v649_v49  ;;  %v1462_v50 = vmov 1326507024  }
 0x364   :  { %1304 = vmatpush3.bf16.msra.mxu0 %v1303_v52  ;;  %v651_v52 = vld [vmem:[#allocation5 + $0x358] sm:$0xff] }
 0x365   :  { %1305 = vmatprep.subr.bf16.mxu0 %v1453_v0  ;;  %v1336_v54 = vpack.c.bf16 %v652_v53, %v651_v52 }
 0x368   :  { %1307 = vmatpush3.bf16.msra.mxu0 %v1306_v55 }
 0x369   :  { %1308 = vmatprep.subr.bf16.mxu0 %v1453_v0 }
 0x36c   :  { %1310 = vmatpush3.bf16.msra.mxu0 %v1309_v58 }
 0x36d   :  { %1311 = vmatprep.subr.bf16.mxu0 %v1453_v0 }
 0x370   :  { %1313 = vmatpush3.bf16.msra.mxu0 %v1312_v61 }
 0x426   :  { %v369_v20 = vpop.f32.mrb[2].mxu0 }
 0x427   :  { %v370_v21 = vadd.f32 %v868_v19, %v369_v20  ;;  %v1088_v22 = vpop.f32.mrb[3].mxu0 }
 0x429   :  { %v869_v23 = vmul.f32 -1.442695, %v370_v21  ;;  %v873_v21 = vld [vmem:[#allocation5 + $0x2d0] ss:$0 sm:$0xff] }
 0x42b   :  { %1361 = vpow2.f32 %v869_v23 }
 0x435   :  { %v1362_v24 = vpop.eup %1361 }
 0x436   :  { %v376_v25 = vadd.f32 1.0, %v1362_v24 }
 0x438   :  { %1363 = vrcp.f32 %v376_v25 }
 0x442   :  { %v1364_v26 = vpop.eup %1363 }
 0x443   :  { %1122 = vmatmul.mubr.f32.vlgmr.msra.gmra.mrb[2].mxu1 %v1364_v26 }
 0x444   :  { %1191 = vmatprep.mubr.msk.f32.mxu1 %vm1454_vm0, %v1455_v1 }
 0x516   :  { %v466_v30 = vpop.f32.mrb[2].mxu1 }
 0x517   :  { %v1565_v31 = vadd.f32 %v870_v29, %v466_v30  ;;  %v1123_v32 = vpop.f32.mrb[3].mxu1 }
 0x518   :  { %v638_v32 = vld [vmem:[#allocation5 + $0x2f0] sm:$0xff] }
 0x519   :  { %v476_v33 = vsel %vm40_vm1, 0.0, %v1565_v31  ;;  %v473_v34 = vsel %vm40_vm1, %v1565_v31, 0.0  ;;  %v472_v35 = vmul.f32 %v1565_v31, %v1565_v31 }
 0x51a   :  { %477 = vadd.xlane.f32.xlu1 %v476_v33  ;;  %474 = vadd.xlane.f32.xlu0 %v473_v34  ;;  %v639_v34 = vld [vmem:[#allocation5 + $0x2f8] sm:$0xff] }
 0x51b   :  { %v482_v36 = vsel %vm40_vm1, 0.0, %v472_v35  ;;  %v479_v37 = vsel %vm40_vm1, %v472_v35, 0.0  ;;  %v640_v35 = vld [vmem:[#allocation5 + $0x300] sm:$0xff] }
 0x51e   :  { %483 = vadd.xlane.f32.xlu1 %v482_v36  ;;  %480 = vadd.xlane.f32.xlu0 %v479_v37  ;;  %v1318_v36 = vpack.c.bf16 %v640_v35, %v639_v34  ;;  %v641_v37 = vld [vmem:[#allocation5 + $0x308] sm:$0xff] }
 0x51f   :  { %v1321_v39 = vpack.c.bf16 %v642_v38, %v641_v37  ;;  %v1458_v38 = vmov 2475754826  }
 0x5a7   :  { %v478_v62 = vpop.xlane.xlu1 %477  ;;  %v475_v63 = vpop.xlane.xlu0 %474 }
 0x5a8   :  { %v485_v2 = vsel %vm40_vm1, %v475_v63, %v478_v62 }
 0x5a9   :  { %v486_v3 = vmul.f32 0.03125, %v485_v2 }
 0x5ab   :  { %v484_v4 = vpop.xlane.xlu1 %483  ;;  %v481_v5 = vpop.xlane.xlu0 %480  ;;  %v489_v7 = vmul.f32 %v486_v3, %v486_v3  ;;  %v492_v12 = vsub.f32 %v1565_v31, %v486_v3  ;;  %v637_v31 = vld [vmem:[#allocation5 + $0x2e8] sm:$0xff] }
 0x5ac   :  { %v487_v6 = vsel %vm40_vm1, %v481_v5, %v484_v4  ;;  %v1315_v33 = vpack.c.bf16 %v638_v32, %v637_v31 }
 0x5ad   :  { %v488_v8 = vmul.f32 0.03125, %v487_v6  ;;  %v874_v6 = vld [vmem:[#allocation5 + $0x2d8] ss:$0 sm:$0xff] }
 0x5ae   :  { %1316 = vmatpush3.bf16.msra.mxu1 %v1315_v33 }
 0x5af   :  { %v490_v9 = vsub.f32 %v488_v8, %v489_v7  ;;  %1317 = vmatprep.subr.bf16.mxu1 %v1453_v0  ;;  %v875_v8 = vld [vmem:[#allocation5 + $0x2e0] ss:$0 sm:$0xff] }
 0x5b1   :  { %v491_v10 = vmax.f32 %v490_v9, 0.0 }
 0x5b2   :  { %1319 = vmatpush3.bf16.msra.mxu1 %v1318_v36  ;;  %v1457_v36 = vmov 683565275  }
 0x5b3   :  { %v493_v11 = vadd.f32 1e-05, %v491_v10  ;;  %1320 = vmatprep.subr.bf16.mxu1 %v1453_v0 }
 0x5b5   :  { %1365 = vrsqrt.f32 %v493_v11 }
 0x5b6   :  { %1322 = vmatpush3.bf16.msra.mxu1 %v1321_v39 }
 0x5b7   :  { %1323 = vmatprep.subr.bf16.mxu1 %v1453_v0 }
 0x5ba   :  { %1325 = vmatpush3.bf16.msra.mxu1 %v1324_v42 }
 0x5bb   :  { %1326 = vmatprep.subr.bf16.mxu1 %v1453_v0 }
 0x5be   :  { %1328 = vmatpush3.bf16.msra.mxu1 %v1327_v45 }
 0x5bf   :  { %v1366_v13 = vpop.eup %1365  ;;  %1329 = vmatprep.subr.bf16.mxu1 %v1453_v0 }
 0x5c0   :  { %v495_v15 = vmul.f32 %v1366_v13, %v492_v12  ;;  %v876_v13 = vld [vmem:[#allocation5 + $0x368] ss:$0 sm:$0xff] }
 0x5c2   :  { %v500_v17 = vmul.f32 %v871_v14, %v495_v15  ;;  %1331 = vmatpush3.bf16.msra.mxu1 %v1330_v48 }
 0x5c3   :  { %1332 = vmatprep.subr.bf16.mxu1 %v1453_v0 }
 0x5c4   :  { %v505_v18 = vadd.f32 %v872_v16, %v500_v17 }
 0x5c6   :  { %v506_v19 = vmul.f32 0.01, %v505_v18  ;;  %1334 = vmatpush3.bf16.msra.mxu1 %v1333_v51 }
 0x5c7   :  { %1335 = vmatprep.subr.bf16.mxu1 %v1453_v0 }
 0x5c8   :  { %v507_v20 = vmax.f32 %v505_v18, %v506_v19 }
 0x5ca   :  { %1157 = vmatmul.mubr.f32.vlgmr.msra.gmra.mrb[4].mxu0 %v507_v20  ;;  %1337 = vmatpush3.bf16.msra.mxu1 %v1336_v54 }
 0x69d   :  { %v595_v22 = vpop.f32.mrb[4].mxu0 }
 0x69e   :  { %v1591_v23 = vadd.f32 %v873_v21, %v595_v22  ;;  %v1158_v24 = vpop.f32.mrb[5].mxu0  ;;  %v42_v22 = vsel %vm41_vm2, 1.5707964, %v1455_v1 }
 0x6a0   :  { %v605_v25 = vsel %vm40_vm1, 0.0, %v1591_v23  ;;  %v602_v26 = vsel %vm40_vm1, %v1591_v23, 0.0  ;;  %v601_v27 = vmul.f32 %v1591_v23, %v1591_v23 }
 0x6a1   :  { %606 = vadd.xlane.f32.xlu1 %v605_v25  ;;  %603 = vadd.xlane.f32.xlu0 %v602_v26 }
 0x6a2   :  { %v611_v29 = vsel %vm40_vm1, 0.0, %v601_v27  ;;  %v608_v30 = vsel %vm40_vm1, %v601_v27, 0.0 }
 0x6a5   :  { %612 = vadd.xlane.f32.xlu1 %v611_v29  ;;  %609 = vadd.xlane.f32.xlu0 %v608_v30 }
 0x72e   :  { %v607_v55 = vpop.xlane.xlu1 %606  ;;  %v604_v56 = vpop.xlane.xlu0 %603 }
 0x72f   :  { %v614_v57 = vsel %vm40_vm1, %v604_v56, %v607_v55 }
 0x730   :  { %v615_v58 = vmul.f32 0.03125, %v614_v57 }
 0x732   :  { %v613_v59 = vpop.xlane.xlu1 %612  ;;  %v610_v60 = vpop.xlane.xlu0 %609  ;;  %v618_v62 = vmul.f32 %v615_v58, %v615_v58  ;;  %v621_v0 = vsub.f32 %v1591_v23, %v615_v58 }
 0x733   :  { %v616_v61 = vsel %vm40_vm1, %v610_v60, %v613_v59 }
 0x734   :  { %v617_v63 = vmul.f32 0.03125, %v616_v61 }
 0x736   :  { %v619_v2 = vsub.f32 %v617_v63, %v618_v62 }
 0x738   :  { %v620_v3 = vmax.f32 %v619_v2, 0.0 }
 0x73a   :  { %v622_v4 = vadd.f32 1e-05, %v620_v3 }
 0x73c   :  { %1367 = vrsqrt.f32 %v622_v4 }
 0x746   :  { %v1368_v5 = vpop.eup %1367 }
 0x747   :  { %v624_v7 = vmul.f32 %v1368_v5, %v621_v0 }
 0x749   :  { %v629_v9 = vmul.f32 %v874_v6, %v624_v7 }
 0x74b   :  { %v634_v10 = vadd.f32 %v875_v8, %v629_v9 }
 0x74d   :  { %v635_v11 = vmul.f32 0.01, %v634_v10 }
 0x74f   :  { %v636_v12 = vmax.f32 %v634_v10, %v635_v11 }
 0x751   :  { %1192 = vmatmul.mubr.f32.vlgmr.msra.gmra.mrb[4].mxu1 %v636_v12 }
 0x824   :  { %v724_v14 = vpop.f32.mrb[4].mxu1 }
 0x825   :  { %v725_v15 = vadd.f32 %v876_v13, %v724_v14  ;;  %v1193_v16 = vpop.f32.mrb[5].mxu1 }
 0x827   :  { %v877_v17 = vmul.f32 -1.442695, %v725_v15 }
 0x829   :  { %1369 = vpow2.f32 %v877_v17 }
 0x833   :  { %v1370_v18 = vpop.eup %1369 }
 0x834   :  { %v731_v19 = vadd.f32 1.0, %v1370_v18 }
 0x836   :  { %1371 = vrcp.f32 %v731_v19 }
 0x840   :  { %v1617_v20 = vpop.eup %1371 }
 0x841   :  { %734 = vrot.lane.b32.xlu0 %v1617_v20, %s1456_s1 }
 0x8b3   :  { %v1621_v21 = vpop.permute.xlu0 %734 }
 0x8b4   :  { %v737_v23 = vsel %vm41_vm2, %v1621_v21, %v1617_v20 }
 0x8b5   :  { %v738_v24 = vmul.f32 6.2831855, %v737_v23 }
 0x8b7   :  { %v1630_v25 = vadd.f32 %v738_v24, %v42_v22 }
 0x8b9   :  { %v743_v26 = vand.u32 2139095040, %v1630_v25  ;;  %v740_v31 = vand.u32 2147483647, %v1630_v25  ;;  %vm742_vm10 = vcmp.lt.s32.totalorder %v1630_v25, 0  ;;  %vm832_vm15 = vweird.f32 %v1630_v25 }
 0x8bb   :  { %v744_v27 = vshrl.u32 %v743_v26, 23  ;;  %v747_v1 = vand.u32 8388607, %v740_v31  ;;  %vm741_vm11 = vcmp.le.f32.partialorder %v740_v31, 0.7853982 }
 0x8bd   :  { %v878_v29 = vadd.s32 4294967169, %v744_v27  ;;  %v748_v52 = vor.u32 8388608, %v747_v1 }
 0x8bf   :  { %v750_v30 = vadd.s32 1, %v878_v29  ;;  %v788_v4 = vshll.u32 %v748_v52, 8 }
 0x8c1   :  { %vm751_vm3 = vcmp.gt.s32.totalorder %v750_v30, 0 }
 0x8c2   :  { %v752_v32 = vsel %vm751_vm3, %v750_v30, 0 }
 0x8c3   :  { %v754_v33 = vand.u32 31, %v752_v32  ;;  %v753_v35 = vshrl.u32 %v752_v32, 5 }
 0x8c5   :  { %v755_v34 = vsub.s32 32, %v754_v33  ;;  %v757_v37 = vshll.u32 %v1457_v36, %v754_v33  ;;  %v760_v39 = vshll.u32 %v1458_v38, %v754_v33  ;;  %v763_v43 = vshll.u32 %v1459_v41, %v754_v33 }
 0x8c6   :  { %v766_v46 = vshll.u32 %v1460_v44, %v754_v33  ;;  %v769_v49 = vshll.u32 %v1461_v47, %v754_v33  ;;  %vm772_vm4 = vcmp.lt.s32.totalorder %v753_v35, 1  ;;  %vm775_vm5 = vcmp.lt.s32.totalorder %v753_v35, 4 }
 0x8c7   :  { %v758_v40 = vshrl.u32 %v1458_v38, %v755_v34  ;;  %v761_v42 = vshrl.u32 %v1459_v41, %v755_v34  ;;  %v764_v45 = vshrl.u32 %v1460_v44, %v755_v34  ;;  %v767_v48 = vshrl.u32 %v1461_v47, %v755_v34 }
 0x8c8   :  { %v770_v51 = vshrl.u32 %v1462_v50, %v755_v34  ;;  %v756_v61 = vshrl.u32 %v1457_v36, %v755_v34  ;;  %vm774_vm6 = vcmp.lt.s32.totalorder %v753_v35, 3  ;;  %vm773_vm7 = vcmp.lt.s32.totalorder %v753_v35, 2 }
 0x8c9   :  { %v759_v53 = vor.u32 %v758_v40, %v757_v37  ;;  %v762_v54 = vor.u32 %v761_v42, %v760_v39  ;;  %v765_v55 = vor.u32 %v764_v45, %v763_v43  ;;  %v768_v56 = vor.u32 %v767_v48, %v766_v46 }
 0x8ca   :  { %v771_v57 = vor.u32 %v770_v51, %v769_v49 }
 0x8cb   :  { %v777_v58 = vsel %vm775_vm5, %v765_v55, 2102212464  ;;  %v780_v59 = vsel %vm772_vm4, %v759_v53, %v762_v54  ;;  %v784_v60 = vsel %vm772_vm4, %v762_v54, %v765_v55  ;;  %v781_v62 = vsel %vm775_vm5, %v768_v56, 920167782 }
 0x8cc   :  { %v785_v63 = vsel %vm775_vm5, %v771_v57, 1326507024  ;;  %v782_v2 = vsel %vm774_vm6, %v765_v55, %v781_v62  ;;  %v776_v0 = vsel %vm772_vm4, %v756_v61, %v759_v53  ;;  %v778_v5 = vsel %vm774_vm6, %v762_v54, %v777_v58 }
 0x8cd   :  { %v786_v3 = vsel %vm774_vm6, %v768_v56, %v785_v63  ;;  %v783_v6 = vsel %vm773_vm7, %v780_v59, %v782_v2  ;;  %v779_v12 = vsel %vm773_vm7, %v776_v0, %v778_v5  ;;  %v736_v56 = vsel %vm41_vm2, %v1617_v20, %v1621_v21 }
 0x8ce   :  { %v787_v7 = vsel %vm773_vm7, %v784_v60, %v786_v3  ;;  %v1639_v10 = vmul.u32.u64.low %v788_v4, %v783_v6  ;;  %v1640_v11 = vmul.u32.u64.high %v788_v4, %v783_v6, %v1639_v10  ;;  %v795_v14 = vmul.u32 %v788_v4, %v779_v12 }
 0x8cf   :  { %v1636_v8 = vmul.u32.u64.low %v788_v4, %v787_v7  ;;  %v1637_v9 = vmul.u32.u64.high %v788_v4, %v787_v7, %v1636_v8 }
 0x8d0   :  { %v798_v13 = vadd.s32 1, %v1640_v11 }
 0x8d1   :  { %vm797_vm8 = vc.u32 %v1637_v9, %v1639_v10  ;;  %v796_v30 = vadd.s32 %v1639_v10, %v1637_v9 }
 0x8d2   :  { %v799_v15 = vsel %vm797_vm8, %v798_v13, %v1640_v11 }
 0x8d3   :  { %v800_v16 = vadd.s32 %v799_v15, %v795_v14 }
 0x8d5   :  { %v801_v17 = vadd.s32 536870912, %v800_v16 }
 0x8d7   :  { %v802_v18 = vshrl.u32 %v801_v17, 30 }
 0x8d9   :  { %v803_v19 = vshll.u32 %v802_v18, 30  ;;  %v826_v42 = vsub.s32 4, %v802_v18 }
 0x8db   :  { %v804_v22 = vsub.s32 %v800_v16, %v803_v19  ;;  %v827_v45 = vsel %vm742_vm10, %v826_v42, %v802_v18 }
 0x8dc   :  { %v829_v47 = vsel %vm741_vm11, 0, %v827_v45 }
 0x8dd   :  { %v806_v23 = vsub.s32 0, %v804_v22  ;;  %v833_v48 = vadd.s32 3, %v829_v47 }
 0x8df   :  { %v879_v24 = vmin.u32 %v806_v23, %v804_v22  ;;  %v834_v49 = vand.u32 3, %v833_v48 }
 0x8e1   :  { %v808_v26 = vclz %v879_v24  ;;  %vm839_vm12 = vcmp.eq.s32.totalorder %v834_v49, 2  ;;  %vm836_vm13 = vcmp.eq.s32.totalorder %v834_v49, 0  ;;  %vm835_vm14 = vcmp.lt.s32.totalorder %v834_v49, 2 }
 0x8e3   :  { %v880_v27 = vadd.s32 4294967294, %v808_v26 }
 0x8e5   :  { %vm881_vm9 = vcmp.lt.s32.totalorder %v880_v27, 0 }
 0x8e6   :  { %v811_v29 = vsel %vm881_vm9, 0, %v880_v27 }
 0x8e7   :  { %v812_v32 = vsub.s32 32, %v811_v29  ;;  %v816_v33 = vsub.s32 4294967266, %v811_v29  ;;  %v813_v1 = vshll.u32 %v804_v22, %v811_v29 }
 0x8e9   :  { %v814_v34 = vshrl.u32 %v796_v30, %v812_v32  ;;  %v817_v35 = vadd.s32 127, %v816_v33 }
 0x8eb   :  { %v815_v36 = vor.u32 %v814_v34, %v813_v1  ;;  %v818_v37 = vshll.u32 %v817_v35, 23 }
 0x8ed   :  { %v819_v38 = vor.u32 4788187, %v818_v37  ;;  %v822_v40 = vcvt.s32.f32 %v815_v36 }
 0x8ef   :  { %v820_v39 = vand.u32 2147483647, %v819_v38 }
 0x8f1   :  { %v823_v41 = vmul.f32 %v822_v40, %v820_v39 }
 0x8f3   :  { %v824_v43 = vxor.u32 2147483648, %v823_v41 }
 0x8f5   :  { %v825_v44 = vsel %vm742_vm10, %v824_v43, %v823_v41 }
 0x8f6   :  { %v828_v46 = vsel %vm741_vm11, %v1630_v25, %v825_v44 }
 0x8f7   :  { %1373 = vcosq.f32 %v828_v46 }
 0x8f8   :  { %1375 = vsinq.f32 %v828_v46 }
 0x901   :  { %v1374_v50 = vpop.eup %1373 }
 0x902   :  { %v1376_v51 = vpop.eup %1375  ;;  %v840_v52 = vxor.u32 2147483648, %v1374_v50 }
 0x903   :  { %v837_v53 = vxor.u32 2147483648, %v1376_v51 }
 0x904   :  { %v841_v54 = vsel %vm839_vm12, %v840_v52, %v1376_v51 }
 0x905   :  { %v838_v55 = vsel %vm836_vm13, %v1374_v50, %v837_v53 }
 0x906   :  { %v842_v31 = vsel %vm835_vm14, %v838_v55, %v841_v54 }
 0x907   :  { %v843_v57 = vsel %vm832_vm15, nan, %v842_v31 }
 0x908   :  { %v844_v58 = vmul.f32 %v843_v57, %v736_v56 }
 0x90a   :  { %845 = vst [vmem:[#allocation7] sm:$0xff] %v844_v58 }
 0x90b   :  { %1432 = shalt.err (!%p1429_p6)
}
 0x90c   :  { %s1433_s11 = scalar_lea.hbm %s1669_s2, 128 }
 0x90d   :  { %p1434_p7 = scmp.ne.s32.totalorder %s1669_s2, %s1433_s11  ;;  %p1437_p8 = scmp.lt.u32.totalorder %s1433_s11, %s1669_s2 }
 0x90f   :  { %p1439_p9 = pnand %p1437_p8, %p1434_p7 }
 0x911   :  { %1442 = shalt.err (!%p1439_p9)
}
 0x912   :  { %855 = dma.vmem_to_hbm [thread:$0]  %s853_s7, 128, %s1669_s2, [#allocation4]  }
 0x913   :  { %1447 = dma.done.wait [#allocation4], 128  }
 0x914   :  { %1448 = vsyncadd [#allocation4], 4294967168 }
 0x915   :  { %859 = vsyncpa [#allocation3], 1 }
 0x916   :  { %860 = vsyncpa [#allocation6], 1 }
 0x917   :  { %861 = vsyncpa [#allocation4], 1 }

</bundles_post_ra>
